<compile_context>
chip_gen: v7x
topology: tpu7x:2x2x1
jax: 0.10.0
libtpu: 0.0.40
codegen_flags: <defaults>
</compile_context>

<pallas_src>
import functools
import math

import jax
import jax.numpy as jnp
import numpy as np
from jax import lax
from jax.experimental import pallas as pl
from jax.experimental.pallas import tpu as pltpu

_MIB = 1024 * 1024


def _pick_tile(dim, candidates):
    """Largest preferred tile that evenly divides `dim`, else the full dim."""
    for c in candidates:
        if dim >= c and dim % c == 0:
            return c
    return dim


def _vmem_limit(footprint_bytes):
    """Footprint-derived VMEM limit, capped so it also fits v7x (64 MiB)."""
    return int(min(max(2 * footprint_bytes, 16 * _MIB), 40 * _MIB))


# ----------------------------------------------------------------------------
# Kernel 1: tiled dense projection  y = x @ W + b
# ----------------------------------------------------------------------------
def _matmul_bias_kernel(x_ref, w_ref, b_ref, o_ref, acc_ref, *, compute_dtype):
    @pl.when(pl.program_id(2) == 0)
    def _init():
        acc_ref[...] = jnp.zeros_like(acc_ref)

    x = x_ref[...]
    w = w_ref[...]
    if compute_dtype is not None:
        x = x.astype(compute_dtype)
        w = w.astype(compute_dtype)
    acc_ref[...] += jnp.dot(x, w, preferred_element_type=jnp.float32)

    @pl.when(pl.program_id(2) == pl.num_programs(2) - 1)
    def _finalize():
        o_ref[...] = (acc_ref[...] + b_ref[...].astype(jnp.float32)
                      ).astype(o_ref.dtype)


def linear(x, w, b, *, compute_dtype=None):
    """x: (M, K), w: (K, N), b: (N,) -> (M, N), tiled with K-reduction grid."""
    m, kdim = x.shape
    n = w.shape[1]
    tm = _pick_tile(m, (512, 256, 128, 64, 32, 16, 8))
    tn = _pick_tile(n, (512, 256, 128))
    tk = _pick_tile(kdim, (512, 256, 128))
    itm = jnp.dtype(x.dtype).itemsize
    footprint = 2 * (tm * tk + tk * tn + tn + tm * tn) * itm + tm * tn * 4
    cost = pl.CostEstimate(
        flops=int(2 * m * n * kdim),
        transcendentals=0,
        bytes_accessed=int((m * kdim * (n // tn) + kdim * n * (m // tm)
                            + n + m * n) * itm))
    kernel = functools.partial(_matmul_bias_kernel, compute_dtype=compute_dtype)
    return pl.pallas_call(
        kernel,
        out_shape=jax.ShapeDtypeStruct((m, n), x.dtype),
        grid_spec=pltpu.PrefetchScalarGridSpec(
            num_scalar_prefetch=0,
            grid=(m // tm, n // tn, kdim // tk),
            in_specs=[
                pl.BlockSpec((tm, tk), lambda i, j, k: (i, k)),
                pl.BlockSpec((tk, tn), lambda i, j, k: (k, j)),
                pl.BlockSpec((1, tn), lambda i, j, k: (0, j)),
            ],
            out_specs=pl.BlockSpec((tm, tn), lambda i, j, k: (i, j)),
            scratch_shapes=[pltpu.VMEM((tm, tn), jnp.float32)],
        ),
        compiler_params=pltpu.CompilerParams(
            dimension_semantics=("parallel", "parallel", "arbitrary"),
            vmem_limit_bytes=_vmem_limit(footprint)),
        cost_estimate=cost,
    )(x, w, b.reshape(1, n))


# ----------------------------------------------------------------------------
# Kernel 2: rotary embedding (applied once per tensor, outside the O(S^2) loop)
# ----------------------------------------------------------------------------
def _rotary_kernel(x_ref, cos_ref, sin_ref, o_ref, *, head_dim, scale):
    x = x_ref[0].astype(jnp.float32)          # (ts, D)
    c = cos_ref[0].astype(jnp.float32)
    s = sin_ref[0].astype(jnp.float32)
    half = head_dim // 2
    if head_dim % 128 == 0:
        # XLU lane rotation + sign flip instead of slice/negate/concat.
        sign = jnp.where(
            lax.broadcasted_iota(jnp.int32, (1, head_dim), 1) < half, -1.0, 1.0)
        xr = pltpu.roll(x, shift=half, axis=-1) * sign
    else:
        xr = jnp.concatenate([-x[:, half:], x[:, :half]], axis=-1)
    o_ref[0] = ((x * c + xr * s) * scale).astype(o_ref.dtype)


def apply_rotary(x, cos, sin, num_heads, *, scale=1.0):
    """x: (B*NH, S, D) head-major; cos/sin: (B, S, D) -> rotated (scaled) x."""
    bh, s, d = x.shape
    ts = _pick_tile(s, (512, 256, 128, 64, 32, 16, 8))
    itm = jnp.dtype(x.dtype).itemsize
    footprint = (2 * 3 * ts * d + 2 * ts * d) * itm
    cost = pl.CostEstimate(
        flops=int(4 * bh * s * d),
        transcendentals=0,
        bytes_accessed=int((2 * x.size + 2 * num_heads * cos.size) * itm))
    kernel = functools.partial(_rotary_kernel, head_dim=d, scale=scale)
    return pl.pallas_call(
        kernel,
        out_shape=jax.ShapeDtypeStruct(x.shape, x.dtype),
        grid_spec=pltpu.PrefetchScalarGridSpec(
            num_scalar_prefetch=0,
            grid=(bh, s // ts),
            in_specs=[
                pl.BlockSpec((1, ts, d), lambda h, i: (h, i, 0)),
                pl.BlockSpec((1, ts, d), lambda h, i: (h // num_heads, i, 0)),
                pl.BlockSpec((1, ts, d), lambda h, i: (h // num_heads, i, 0)),
            ],
            out_specs=pl.BlockSpec((1, ts, d), lambda h, i: (h, i, 0)),
        ),
        compiler_params=pltpu.CompilerParams(
            dimension_semantics=("parallel", "parallel"),
            vmem_limit_bytes=_vmem_limit(footprint)),
        cost_estimate=cost,
    )(x, cos, sin)


# ----------------------------------------------------------------------------
# Kernel 3: causal flash attention (online softmax), head axis in the grid
# ----------------------------------------------------------------------------
def _flash_attn_kernel(q_ref, k_ref, v_ref, o_ref, m_ref, l_ref, acc_ref,
                       *, tq, tk, approx_recip, compute_dtype):
    qi = pl.program_id(1)
    ki = pl.program_id(2)
    num_kv = pl.num_programs(2)
    neg_min = jnp.finfo(jnp.float32).min

    @pl.when(ki == 0)
    def _init():
        m_ref[...] = jnp.full_like(m_ref, -jnp.inf)
        l_ref[...] = jnp.zeros_like(l_ref)
        acc_ref[...] = jnp.zeros_like(acc_ref)

    def _accumulate(masked):
        q = q_ref[0]                           # (tq, d), pre-rotated + pre-scaled
        k = k_ref[0]                           # (tk, d), pre-rotated
        v = v_ref[0]
        if compute_dtype is not None:
            q = q.astype(compute_dtype)
            k = k.astype(compute_dtype)
            v = v.astype(compute_dtype)
        # QK^T contracting the last dims of both operands (no K transpose).
        s = lax.dot_general(q, k, dimension_numbers=(((1,), (1,)), ((), ())),
                            preferred_element_type=jnp.float32)   # (tq, tk)
        if masked:
            # "scores + mask, then clamp at finfo.min" == masked -> finfo.min.
            row = qi * tq + lax.broadcasted_iota(jnp.int32, (tq, tk), 0)
            col = ki * tk + lax.broadcasted_iota(jnp.int32, (tq, tk), 1)
            s = jnp.where(row >= col, s, neg_min)
        m_prev = m_ref[...]                                        # (tq, 1)
        m_new = jnp.maximum(m_prev, jnp.max(s, axis=-1, keepdims=True))
        alpha = jnp.exp(m_prev - m_new)
        p = jnp.exp(s - m_new)                                     # (tq, tk)
        l_ref[...] = alpha * l_ref[...] + jnp.sum(p, axis=-1, keepdims=True)
        pv = lax.dot_general(p.astype(v.dtype), v,
                             dimension_numbers=(((1,), (0,)), ((), ())),
                             preferred_element_type=jnp.float32)   # (tq, d)
        acc_ref[...] = alpha * acc_ref[...] + pv
        m_ref[...] = m_new

    q_first = qi * tq
    q_last = qi * tq + (tq - 1)
    k_first = ki * tk
    k_last = ki * tk + (tk - 1)

    # Interior tile (fully at/below the diagonal): mask-free fast path.
    @pl.when(k_last <= q_first)
    def _interior():
        _accumulate(masked=False)

    # Diagonal tile (straddles the diagonal): masked path.
    @pl.when(jnp.logical_and(k_last > q_first, k_first <= q_last))
    def _diag():
        _accumulate(masked=True)

    # Fully-above-diagonal tiles: compute skipped, and their KV DMA is elided
    # by the clamped index_map in the wrapper.

    @pl.when(ki == num_kv - 1)
    def _finalize():
        inv_l = pl.reciprocal(l_ref[...], approx=approx_recip)
        o_ref[0] = (acc_ref[...] * inv_l).astype(o_ref.dtype)


def flash_attention(q, k, v, *, approx_recip=False, compute_dtype=None):
    """q/k/v: (B*NH, S, D); q pre-rotated+scaled, k pre-rotated -> (B*NH, S, D)."""
    bh, s, d = q.shape
    tq = _pick_tile(s, (256, 128, 64, 32, 16, 8))
    tk = _pick_tile(s, (256, 128, 64, 32, 16, 8))
    n_q, n_k = s // tq, s // tk
    itm = jnp.dtype(q.dtype).itemsize
    footprint = (2 * tq * d + 4 * tk * d + 2 * tq * d) * itm + (tq * d + 2 * tq) * 4
    kv_passes = max(1, (n_q + 1) // 2)     # causal: each KV tile read ~(n_q+1)/2 x
    cost = pl.CostEstimate(
        flops=int(2 * bh * s * s * d),     # QK^T + PV (causal ~halves this)
        transcendentals=int(bh * s * s // 2),
        bytes_accessed=int((2 * q.size + (k.size + v.size) * kv_passes) * itm))

    def kv_index(b, qi, ki):
        # Clamp to the last valid (diagonal) KV block for this q tile so the
        # block index repeats on above-diagonal steps and Pallas skips the DMA.
        return (b, jnp.minimum(ki, (qi * tq + tq - 1) // tk), 0)

    kernel = functools.partial(_flash_attn_kernel, tq=tq, tk=tk,
                               approx_recip=approx_recip,
                               compute_dtype=compute_dtype)
    return pl.pallas_call(
        kernel,
        out_shape=jax.ShapeDtypeStruct((bh, s, d), q.dtype),
        grid_spec=pltpu.PrefetchScalarGridSpec(
            num_scalar_prefetch=0,
            grid=(bh, n_q, n_k),
            in_specs=[
                pl.BlockSpec((1, tq, d), lambda b, qi, ki: (b, qi, 0)),
                pl.BlockSpec((1, tk, d), kv_index),
                pl.BlockSpec((1, tk, d), kv_index),
            ],
            out_specs=pl.BlockSpec((1, tq, d), lambda b, qi, ki: (b, qi, 0)),
            scratch_shapes=[
                pltpu.VMEM((tq, 1), jnp.float32),   # running max m
                pltpu.VMEM((tq, 1), jnp.float32),   # running denom l
                pltpu.VMEM((tq, d), jnp.float32),   # output accumulator
            ],
        ),
        compiler_params=pltpu.CompilerParams(
            dimension_semantics=("parallel", "parallel", "arbitrary"),
            vmem_limit_bytes=_vmem_limit(footprint)),
        cost_estimate=cost,
    )(q, k, v)


# ----------------------------------------------------------------------------
# InternLMAttention parameters + forward orchestration
# ----------------------------------------------------------------------------
def make_rotary_cache(head_dim, max_pos, base=10000.0, dtype=jnp.float32):
    inv_freq = 1.0 / (base ** (jnp.arange(0, head_dim, 2, dtype=jnp.float32)
                               / head_dim))
    t = jnp.arange(max_pos, dtype=jnp.float32)
    freqs = jnp.einsum("i,j->ij", t, inv_freq)
    emb = jnp.concatenate([freqs, freqs], axis=-1)          # (max_pos, D)
    return jnp.cos(emb).astype(dtype), jnp.sin(emb).astype(dtype)


def init_params(key, hidden_size):
    ks = jax.random.split(key, 8)
    scale = 1.0 / math.sqrt(hidden_size)

    def lin(kw, kb):
        w = jax.random.uniform(kw, (hidden_size, hidden_size),
                               jnp.float32, -scale, scale)
        b = jax.random.uniform(kb, (hidden_size,), jnp.float32, -scale, scale)
        return w, b

    params = {}
    for i, name in enumerate(["q", "k", "v", "o"]):
        params[name + "_w"], params[name + "_b"] = lin(ks[2 * i], ks[2 * i + 1])
    # fused QKV weight/bias for the single projection kernel
    params["qkv_w"] = jnp.concatenate(
        [params["q_w"], params["k_w"], params["v_w"]], axis=1)    # (H, 3H)
    params["qkv_b"] = jnp.concatenate(
        [params["q_b"], params["k_b"], params["v_b"]], axis=0)    # (3H,)
    return params


def internlm_attention_forward(params, hidden_states, position_ids, num_heads,
                               cos_cached, sin_cached, *, compute_dtype=None,
                               approx_recip=None):
    b, s, h = hidden_states.shape
    d = h // num_heads
    dtype = hidden_states.dtype
    if approx_recip is None:
        # exact reciprocal keeps the f32 verification tight; reduced-precision
        # models take the (effectively free) EUP approx path.
        approx_recip = jnp.dtype(dtype) != jnp.dtype(jnp.float32)

    # fused Q/K/V projection (one tiled Pallas matmul over the (H, 3H) weight)
    x2d = hidden_states.reshape(b * s, h)
    qkv = linear(x2d, params["qkv_w"], params["qkv_b"],
                 compute_dtype=compute_dtype)                  # (B*S, 3H)

    # head-major layout (3, B*NH, S, D): one XLA HBM transpose buys contiguous
    # per-head tiles and a head-axis grid (no in-kernel sublane gathers).
    qkv = qkv.reshape(b, s, 3, num_heads, d).transpose(2, 0, 3, 1, 4)
    qkv = qkv.reshape(3, b * num_heads, s, d)

    # rotary cos/sin gathered at position_ids -> (B, S, D)
    cos = cos_cached[position_ids].astype(dtype)
    sin = sin_cached[position_ids].astype(dtype)

    # rotary applied ONCE (outside the O(S^2) KV loop); Q is pre-scaled.
    q = apply_rotary(qkv[0], cos, sin, num_heads, scale=1.0 / math.sqrt(d))
    k = apply_rotary(qkv[1], cos, sin, num_heads, scale=1.0)
    v = qkv[2]

    # causal flash attention over the (B*NH, S//tq, S//tk) grid
    attn = flash_attention(q, k, v, approx_recip=approx_recip,
                           compute_dtype=compute_dtype)        # (B*NH, S, D)

    # back to (B*S, H) for the output projection
    attn = attn.reshape(b, num_heads, s, d).transpose(0, 2, 1, 3)
    out = linear(attn.reshape(b * s, h), params["o_w"], params["o_b"],
                 compute_dtype=compute_dtype)
    return out.reshape(b, s, h)


# ----------------------------------------------------------------------------
# Pure-JAX reference (mirrors the PyTorch forward) for verification
# ----------------------------------------------------------------------------
def reference_forward(params, hidden_states, attention_mask, position_ids,
                      num_heads, cos_cached, sin_cached):
    b, s, h = hidden_states.shape
    d = h // num_heads
    q = (hidden_states @ params["q_w"] + params["q_b"]).reshape(
        b, s, num_heads, d).transpose(0, 2, 1, 3)
    k = (hidden_states @ params["k_w"] + params["k_b"]).reshape(
        b, s, num_heads, d).transpose(0, 2, 1, 3)
    v = (hidden_states @ params["v_w"] + params["v_b"]).reshape(
        b, s, num_heads, d).transpose(0, 2, 1, 3)

    cos = cos_cached[position_ids][:, None, :, :]
    sin = sin_cached[position_ids][:, None, :, :]

    def rot_half(x):
        x1 = x[..., : d // 2]
        x2 = x[..., d // 2:]
        return jnp.concatenate([-x2, x1], axis=-1)

    q = q * cos + rot_half(q) * sin
    k = k * cos + rot_half(k) * sin

    scores = jnp.einsum("bhqd,bhkd->bhqk", q, k) / math.sqrt(d)
    scores = scores + attention_mask
    scores = jnp.maximum(scores, jnp.finfo(jnp.float32).min)
    probs = jax.nn.softmax(scores.astype(jnp.float32), axis=-1)
    out = jnp.einsum("bhqk,bhkd->bhqd", probs, v)
    out = out.transpose(0, 2, 1, 3).reshape(b, s, h)
    return out @ params["o_w"] + params["o_b"]


if __name__ == "__main__":
    # Small config: batch=2, seq=8, hidden=32, heads=4, head_dim=8
    B, S, HIDDEN, NH = 2, 8, 32, 4
    D = HIDDEN // NH
    MAX_POS = 64

    key = jax.random.PRNGKey(0)
    k_x, k_p = jax.random.split(key)
    hidden_states = jax.random.normal(k_x, (B, S, HIDDEN), jnp.float32)
    params = init_params(k_p, HIDDEN)

    position_ids = jnp.broadcast_to(jnp.arange(S, dtype=jnp.int32)[None, :],
                                    (B, S))
    cos_cached, sin_cached = make_rotary_cache(D, MAX_POS)

    out = internlm_attention_forward(params, hidden_states, position_ids, NH,
                                     cos_cached, sin_cached)
    out = jax.block_until_ready(out)

    # HF-style causal additive mask, used only by the pure-JAX reference
    neg = jnp.finfo(jnp.float32).min
    causal = jnp.tril(jnp.ones((S, S), jnp.float32))
    attention_mask = jnp.where(causal == 1.0, 0.0, neg)[None, None, :, :]
    attention_mask = jnp.broadcast_to(attention_mask, (B, 1, S, S))

    ref = reference_forward(params, hidden_states, attention_mask,
                            position_ids, NH, cos_cached, sin_cached)
    np.testing.assert_allclose(np.asarray(out), np.asarray(ref),
                               rtol=2e-5, atol=2e-5)

    print("KERNEL_OK")
</pallas_src>

<mosaic_0001>
module attributes {stable_mosaic.version = 11 : i64} {
  func.func @_matmul_bias_kernel(%arg0: i32, %arg1: i32, %arg2: i32, %arg3: memref<16x32xf32, #tpu.memory_space<vmem>>, %arg4: memref<32x96xf32, #tpu.memory_space<vmem>>, %arg5: memref<1x96xf32, #tpu.memory_space<vmem>>, %arg6: memref<16x96xf32, #tpu.memory_space<vmem>>, %arg7: memref<16x96xf32, #tpu.memory_space<vmem>>) attributes {dimension_semantics = [#tpu.dimension_semantics<parallel>, #tpu.dimension_semantics<parallel>, #tpu.dimension_semantics<arbitrary>], iteration_bounds = array<i64: 1, 1, 1>, scalar_prefetch = 0 : i64, scratch_operands = 1 : i64, tpu.core_type = #tpu.core_type<tc>, window_params = [{transform_indices = @transform_0, window_bounds = array<i64: 16, 32>}, {transform_indices = @transform_1, window_bounds = array<i64: 32, 96>}, {transform_indices = @transform_2, window_bounds = array<i64: 1, 96>}, {transform_indices = @transform_3, window_bounds = array<i64: 16, 96>}]} {
    %c0_i32 = arith.constant 0 : i32
    %0 = arith.cmpi eq, %arg2, %c0_i32 : i32
    %1 = arith.extui %0 : i1 to i32
    %c0_i32_0 = arith.constant 0 : i32
    %2 = arith.cmpi ne, %1, %c0_i32_0 : i32
    scf.if %2 {
      %cst_10 = arith.constant 0.000000e+00 : f32
      %12 = vector.broadcast %cst_10 : f32 to vector<16x96xf32>
      %c0_11 = arith.constant 0 : index
      %c0_12 = arith.constant 0 : index
      %13 = vector.load %arg7[%c0_11, %c0_12] : memref<16x96xf32, #tpu.memory_space<vmem>>, vector<16x96xf32>
      tpu.vector_store %arg7[%c0_11, %c0_12], %12 {strides = array<i32>} : memref<16x96xf32, #tpu.memory_space<vmem>>, vector<16x96xf32>,
    } else {
    }
    %c0 = arith.constant 0 : index
    %c0_1 = arith.constant 0 : index
    %3 = vector.load %arg3[%c0, %c0_1] : memref<16x32xf32, #tpu.memory_space<vmem>>, vector<16x32xf32>
    %c0_2 = arith.constant 0 : index
    %c0_3 = arith.constant 0 : index
    %4 = vector.load %arg4[%c0_2, %c0_3] : memref<32x96xf32, #tpu.memory_space<vmem>>, vector<32x96xf32>
    %c0_4 = arith.constant 0 : index
    %c0_5 = arith.constant 0 : index
    %5 = vector.load %arg7[%c0_4, %c0_5] : memref<16x96xf32, #tpu.memory_space<vmem>>, vector<16x96xf32>
    %cst = arith.constant dense<0.000000e+00> : vector<16x96xf32>
    %6 = tpu.matmul %3, %4, %cst {dimension_numbers = #tpu.dot_dimension_numbers<[1], [0], [0], [1], [0, 0, 1, 1], [], []>} : vector<16x32xf32>, vector<32x96xf32>, vector<16x96xf32> -> vector<16x96xf32>
    %7 = arith.addf %5, %6 : vector<16x96xf32>
    %c0_6 = arith.constant 0 : index
    %c0_7 = arith.constant 0 : index
    %8 = vector.load %arg7[%c0_6, %c0_7] : memref<16x96xf32, #tpu.memory_space<vmem>>, vector<16x96xf32>
    tpu.vector_store %arg7[%c0_6, %c0_7], %7 {strides = array<i32>} : memref<16x96xf32, #tpu.memory_space<vmem>>, vector<16x96xf32>,
    %c0_i32_8 = arith.constant 0 : i32
    %9 = arith.cmpi eq, %arg2, %c0_i32_8 : i32
    %10 = arith.extui %9 : i1 to i32
    %c0_i32_9 = arith.constant 0 : i32
    %11 = arith.cmpi ne, %10, %c0_i32_9 : i32
    scf.if %11 {
      %c0_10 = arith.constant 0 : index
      %c0_11 = arith.constant 0 : index
      %12 = vector.load %arg7[%c0_10, %c0_11] : memref<16x96xf32, #tpu.memory_space<vmem>>, vector<16x96xf32>
      %c0_12 = arith.constant 0 : index
      %c0_13 = arith.constant 0 : index
      %13 = vector.load %arg5[%c0_12, %c0_13] : memref<1x96xf32, #tpu.memory_space<vmem>>, vector<1x96xf32>
      %14 = vector.broadcast %13 : vector<1x96xf32> to vector<16x96xf32>
      %15 = arith.addf %12, %14 : vector<16x96xf32>
      %c0_14 = arith.constant 0 : index
      %c0_15 = arith.constant 0 : index
      %16 = vector.load %arg6[%c0_14, %c0_15] : memref<16x96xf32, #tpu.memory_space<vmem>>, vector<16x96xf32>
      tpu.vector_store %arg6[%c0_14, %c0_15], %15 {strides = array<i32>} : memref<16x96xf32, #tpu.memory_space<vmem>>, vector<16x96xf32>,
    } else {
    }
    return
  }
  func.func @transform_0(%arg0: i32, %arg1: i32, %arg2: i32) -> (i32, i32) {
    %c0_i32 = arith.constant 0 : i32
    return %arg0, %arg2 : i32, i32
  }
  func.func @transform_1(%arg0: i32, %arg1: i32, %arg2: i32) -> (i32, i32) {
    %c0_i32 = arith.constant 0 : i32
    return %arg2, %arg1 : i32, i32
  }
  func.func @transform_2(%arg0: i32, %arg1: i32, %arg2: i32) -> (i32, i32) {
    %c0_i32 = arith.constant 0 : i32
    %c0_i32_0 = arith.constant 0 : i32
    return %c0_i32, %arg1 : i32, i32
  }
  func.func @transform_3(%arg0: i32, %arg1: i32, %arg2: i32) -> (i32, i32) {
    %c0_i32 = arith.constant 0 : i32
    return %arg0, %arg1 : i32, i32
  }
}

</mosaic_0001>

<bundles_post_ra>
// kernel: tpu_custom_call.1
= control target key start
LH: loop header
LB: loop body
LE: loop exit
PB: predicated region body
PF: predicated region fallthrough
CT: control target
= control target key end

     0   :  { %8 = vsyncpa [#allocation4], 0  ;;  %s365_s0 = inlined_call_operand.hbm [shape: f32[16,32], index: 0, kind: input, shape index: {}]   ;;  %s366_s1 = inlined_call_operand.hbm [shape: f32[32,96], index: 1, kind: input, shape index: {}]   ;;  %s367_s2 = inlined_call_operand.vmem [shape: f32[1,96], index: 2, kind: input, shape index: {}]   ;;  %s368_s3 = inlined_call_operand.hbm [shape: f32[16,96], index: 3, kind: output, shape index: {}]  }
   0x1   :  { %9 = vsyncpa [#allocation7], 0 }
   0x2   :  { %10 = vsyncpa [#allocation5], 0  ;;  %s285_s12 = smov [#allocation3]   ;;  %s213_s16 = scalar_lea.hbm %s365_s0, 256 }
   0x3   :  { %s16_s13 = sshll.u32 %s285_s12, 4  ;;  %p214_p0 = scmp.ne.s32.totalorder %s365_s0, %s213_s16  ;;  %s17_s13 = int_to_ptr.vmem [resolvable:$true] %s16_s13 }
   0x4   :  { %p217_p1 = scmp.lt.u32.totalorder %s213_s16, %s365_s0 }
   0x6   :  { %p219_p2 = pnand %p217_p1, %p214_p0 }
   0x8   :  { %222 = shalt.err (!%p219_p2)
}
   0x9   :  { %s223_s21 = scalar_lea.vmem %s17_s13, 256  ;;  %p228_p4 = scmp.lt.s32.totalorder %s17_s13, %s17_s13 }
   0xa   :  { %p224_p3 = scmp.ne.s32.totalorder %s17_s13, %s223_s21  ;;  %p229_p5 = scmp.lt.s32.totalorder %s223_s21, %s223_s21 }
   0xc   :  { %p230_p6 = por %p229_p5, %p228_p4 }
   0xe   :  { %p231_p7 = pnand %p230_p6, %p224_p3 }
  0x10   :  { %234 = shalt.err (!%p231_p7)
}
  0x11   :  { %s286_s22 = smov 128   ;;  %s287_s23 = smov 8  }
  0x12   :  { %22 = dma.hbm_to_vmem [thread:$0]  %s365_s0, 256, %s17_s13, [#allocation4], %s286_s22, %s286_s22, %s287_s23  }
  0x13   :  { %s288_s26 = smov [#allocation6]   ;;  %s235_s30 = scalar_lea.hbm %s366_s1, 512 }
  0x14   :  { %s28_s27 = sshll.u32 %s288_s26, 4  ;;  %p236_p8 = scmp.ne.s32.totalorder %s366_s1, %s235_s30  ;;  %s29_s27 = int_to_ptr.vmem [resolvable:$true] %s28_s27 }
  0x15   :  { %p239_p9 = scmp.lt.u32.totalorder %s235_s30, %s366_s1 }
  0x17   :  { %p241_p10 = pnand %p239_p9, %p236_p8 }
  0x19   :  { %244 = shalt.err (!%p241_p10)
}
  0x1a   :  { %s245_s8 = scalar_lea.vmem %s29_s27, 512  ;;  %p250_p12 = scmp.lt.s32.totalorder %s29_s27, %s29_s27 }
  0x1b   :  { %p246_p11 = scmp.ne.s32.totalorder %s29_s27, %s245_s8  ;;  %p251_p13 = scmp.lt.s32.totalorder %s245_s8, %s245_s8 }
  0x1d   :  { %p252_p0 = por %p251_p13, %p250_p12 }
  0x1f   :  { %p253_p1 = pnand %p252_p0, %p246_p11 }
  0x21   :  { %256 = shalt.err (!%p253_p1)
}
  0x22   :  { %34 = dma.hbm_to_vmem [thread:$0]  %s366_s1, 512, %s29_s27, [#allocation7], %s286_s22, %s286_s22, %s287_s23  }
  0x23   :  { %279 = dma.done.wait [#allocation4], 256  }
  0x24   :  { %280 = vsyncadd [#allocation4], 4294967040 }
  0x25   :  { %281 = dma.done.wait [#allocation7], 512  }
  0x26   :  { %282 = vsyncadd [#allocation7], 4294966784  ;;  %vm47_vm0 = vcmask 785408   ;;  %v289_v0 = vmov 0.0   ;;  %vm58_vm1 = vcmask 261120   ;;  %v52_v1 = vld [vmem:[#allocation6] sm:$0xff] }
  0x27   :  { %49 = vst.msk [vmem:[#allocation2 + $0x8] sm:$0xff] %vm47_vm0, %v289_v0  ;;  %48 = vst.msk [vmem:[#allocation2] sm:$0xff] %vm47_vm0, %v289_v0  ;;  %v53_v2 = vld [vmem:[#allocation6 + $0x8] sm:$0xff]  ;;  %v54_v3 = vld [vmem:[#allocation6 + $0x10] sm:$0xff]  ;;  %s290_s11 = smov [#allocation8]  }
  0x28   :  { %v199_v4 = vpack.c.bf16 %v53_v2, %v52_v1  ;;  %v55_v5 = vld [vmem:[#allocation6 + $0x18] sm:$0xff]  ;;  %v50_v6 = vld [vmem:[#allocation3] sm:$0xff]  ;;  %v181_v15 = vld [vmem:[%s367_s2] ss:$0 sm:$0xff]  ;;  %s166_s12 = sshll.u32 %s290_s11, 4  ;;  %s167_s12 = int_to_ptr.vmem [resolvable:$true] %s166_s12 }
  0x29   :  { %v203_v7 = vpack.c.bf16 %v55_v5, %v54_v3  ;;  %196 = vmatprep.mubr.msk.f32.mxu0 %vm58_vm1, %v50_v6  ;;  %v51_v8 = vld [vmem:[#allocation3 + $0x8] sm:$0xff]  ;;  %s257_s13 = scalar_lea.vmem %s167_s12, 256  ;;  %p262_p3 = scmp.lt.s32.totalorder %s167_s12, %s167_s12 }
  0x2a   :  { %200 = vmatprep.subr.bf16.mxu0 %v199_v4  ;;  %p258_p2 = scmp.ne.s32.totalorder %s167_s12, %s257_s13  ;;  %p263_p4 = scmp.lt.s32.totalorder %s257_s13, %s257_s13 }
  0x2b   :  { %202 = vmatpush3.bf16.msra.mxu0 %v199_v4 }
  0x2c   :  { %204 = vmatprep.subr.bf16.mxu0 %v203_v7  ;;  %p264_p5 = por %p263_p4, %p262_p3 }
  0x2e   :  { %v57_v9 = vld [vmem:[#allocation2 + $0x8] sm:$0xff]  ;;  %v56_v10 = vld [vmem:[#allocation2] sm:$0xff]  ;;  %p265_p6 = pnand %p264_p5, %p258_p2 }
  0x2f   :  { %206 = vmatpush3.bf16.msra.mxu0 %v203_v7 }
  0x32   :  { %197 = vmatmul.mubr.msk.f32.vlgmr.msra.gmra.mrb[0].mxu0 %vm58_vm1, %v51_v8 }
 0x105   :  { %v198_v11 = vpop.f32.mrb[0].mxu0 }
 0x106   :  { %v141_v12 = vadd.f32 %v198_v11, %v57_v9  ;;  %v131_v13 = vpop.f32.mrb[1].mxu0 }
 0x107   :  { %v140_v14 = vadd.f32 %v131_v13, %v56_v10 }
 0x108   :  { %144 = vst.msk [vmem:[#allocation2 + $0x8] sm:$0xff] %vm47_vm0, %v141_v12 }
 0x109   :  { %143 = vst.msk [vmem:[#allocation2] sm:$0xff] %vm47_vm0, %v140_v14 }
 0x10f   :  { %v149_v16 = vld [vmem:[#allocation2 + $0x8] sm:$0xff] }
 0x110   :  { %v148_v17 = vld [vmem:[#allocation2] sm:$0xff]  ;;  %v158_v18 = vadd.f32 %v181_v15, %v149_v16 }
 0x111   :  { %v157_v19 = vadd.f32 %v181_v15, %v148_v17 }
 0x112   :  { %160 = vst.msk [vmem:[#allocation8 + $0x8] sm:$0xff] %vm47_vm0, %v158_v18 }
 0x113   :  { %159 = vst.msk [vmem:[#allocation8] sm:$0xff] %vm47_vm0, %v157_v19 }
 0x114   :  { %268 = shalt.err (!%p265_p6)
}
 0x115   :  { %s269_s15 = scalar_lea.hbm %s368_s3, 256 }
 0x116   :  { %p270_p7 = scmp.ne.s32.totalorder %s368_s3, %s269_s15  ;;  %p273_p8 = scmp.lt.u32.totalorder %s269_s15, %s368_s3 }
 0x118   :  { %p275_p9 = pnand %p273_p8, %p270_p7 }
 0x11a   :  { %278 = shalt.err (!%p275_p9)
}
 0x11b   :  { %172 = dma.vmem_to_hbm [thread:$0]  %s167_s12, 256, %s368_s3, [#allocation5], %s286_s22, %s286_s22, %s287_s23  }
 0x11c   :  { %283 = dma.done.wait [#allocation5], 256  }
 0x11d   :  { %284 = vsyncadd [#allocation5], 4294967040 }
 0x11e   :  { %176 = vsyncpa [#allocation4], 1 }
 0x11f   :  { %177 = vsyncpa [#allocation7], 1 }
 0x120   :  { %178 = vsyncpa [#allocation5], 1 }

</bundles_post_ra>
